<compile_context>
chip_gen: v7x
topology: tpu7x:2x2x1
jax: 0.10.0
libtpu: 0.0.40
codegen_flags: <defaults>
</compile_context>

<pallas_src>
import functools
import math
from collections import namedtuple

import numpy as np
import jax
import jax.numpy as jnp
from jax import lax
from jax.experimental import pallas as pl
from jax.experimental.pallas import tpu as pltpu


# ----------------------------------------------------------------------------- helpers
def rup(n, m):
    return ((n + m - 1) // m) * m


def pad2d(a, r, c, dtype=jnp.float32):
    a = jnp.asarray(a)
    out = jnp.zeros((r, c), dtype)
    return out.at[:a.shape[0], :a.shape[1]].set(a.astype(dtype))


def row_tile(np_):
    # 256-row tiles fill the 2x256x256 MXU on v6e/v7x; 128 when the padded size is small.
    return 256 if np_ % 256 == 0 else 128


def k_tile(np_):
    if np_ % 512 == 0:
        return 512
    if np_ % 256 == 0:
        return 256
    return 128


# ----------------------------------------------------------------------------- Pallas kernels
def preproj_kernel(x_ref, wstk_ref, b_ref, xw_ref, xr_ref):
    # x: (TN, Cip) bf16 ; wstk = [W_rel^T | W_root^T]: (Cip, 2*Cop) bf16 ; b: (1, Cop) f32
    y = jnp.dot(x_ref[...], wstk_ref[...], preferred_element_type=jnp.float32)
    cop = xw_ref.shape[1]
    xw_ref[...] = y[:, :cop].astype(jnp.bfloat16)      # streamed operand of the agg matmul
    xr_ref[...] = y[:, cop:] + b_ref[...]               # root term + bias, kept in f32


def agg_kernel(adj_ref, xw_ref, xr_ref, o_ref, acc_ref, *, apply_norm_relu):
    # adj: (TN, TK) bf16 ; xw: (TK, Cop) bf16 ; xr: (TN, Cop) f32 ; acc: (TN, Cop) f32 scratch
    k = pl.program_id(1)

    @pl.when(k == 0)
    def _():
        acc_ref[...] = jnp.zeros_like(acc_ref)

    acc_ref[...] += jnp.dot(adj_ref[...], xw_ref[...],
                            preferred_element_type=jnp.float32)

    @pl.when(k == pl.num_programs(1) - 1)
    def _():
        y = acc_ref[...] + xr_ref[...]
        if apply_norm_relu:
            # F.normalize: h / clamp_min(||h||_2, 1e-12)   (rsqrt -> EUP slot), then ReLU
            sumsq = jnp.sum(y * y, axis=-1, keepdims=True)
            y = y * lax.rsqrt(jnp.maximum(sumsq, 1e-24))
            y = jnp.maximum(y, 0.0)
        o_ref[...] = y


def edge_score_kernel(ef_ref, w_ref, b_ref, o_ref):
    # Linear(2*hid -> 1) as a VPU reduction (Cout=1 would waste 127/128 MXU columns).
    s = jnp.sum(ef_ref[...] * w_ref[...], axis=-1, keepdims=True)
    o_ref[...] = s + b_ref[0]


def mu_lv_sample_kernel(h_ref, w_ref, b_ref, eps_ref, mu_ref, lv_ref, z_ref):
    # Fused mu/log_var linears (stacked weights) + VAE reparameterisation.
    # eps ~ U[0,1) is generated outside the kernel (portable; the TPU HW PRNG has no
    # CPU/interpret lowering).
    y = jnp.dot(h_ref[...], w_ref[...], preferred_element_type=jnp.float32) + b_ref[...]
    cp = mu_ref.shape[1]
    mu = y[:, :cp]
    lv = y[:, cp:]
    mu_ref[...] = mu
    lv_ref[...] = lv
    std = jnp.exp(0.5 * lv)
    # NOTE: reproduces the module as written: z = eps * (std + mu)
    z_ref[...] = eps_ref[...] * (std + mu)


# ----------------------------------------------------------------------------- kernel wrappers
def graph_conv(x, adj, prep, apply_norm_relu):
    # x: [N, Cin] f32, adj: [N, N] (dense multiplicities), prep: prepared padded weights
    N = x.shape[0]
    Cip, Cop, Cout = prep["cip"], prep["cop"], prep["cout"]
    Np = rup(max(N, 1), 128)
    TN = row_tile(Np)
    TK = k_tile(Np)

    xp = pad2d(x, Np, Cip, jnp.bfloat16)
    adjp = pad2d(adj, Np, Np, jnp.bfloat16)   # small integer multiplicities: exact in bf16

    # pass 1: xw = x @ W_rel^T (bf16), xr = x @ W_root^T + b (f32) — one fused matmul
    xw, xr = pl.pallas_call(
        preproj_kernel,
        out_shape=(jax.ShapeDtypeStruct((Np, Cop), jnp.bfloat16),
                   jax.ShapeDtypeStruct((Np, Cop), jnp.float32)),
        grid=(Np // TN,),
        in_specs=[pl.BlockSpec((TN, Cip), lambda i: (i, 0)),
                  pl.BlockSpec((Cip, 2 * Cop), lambda i: (0, 0)),
                  pl.BlockSpec((1, Cop), lambda i: (0, 0))],
        out_specs=(pl.BlockSpec((TN, Cop), lambda i: (i, 0)),
                   pl.BlockSpec((TN, Cop), lambda i: (i, 0))),
        compiler_params=pltpu.CompilerParams(dimension_semantics=("parallel",)),
    )(xp, prep["wstk"], prep["b"])

    # pass 2: K-tiled aggregation  out = adj @ xw + xr   (f32 accumulator in VMEM scratch)
    kernel = functools.partial(agg_kernel, apply_norm_relu=apply_norm_relu)
    out = pl.pallas_call(
        kernel,
        out_shape=jax.ShapeDtypeStruct((Np, Cop), jnp.float32),
        grid=(Np // TN, Np // TK),
        in_specs=[pl.BlockSpec((TN, TK), lambda i, k: (i, k)),
                  pl.BlockSpec((TK, Cop), lambda i, k: (k, 0)),
                  pl.BlockSpec((TN, Cop), lambda i, k: (i, 0))],
        out_specs=pl.BlockSpec((TN, Cop), lambda i, k: (i, 0)),
        scratch_shapes=[pltpu.VMEM((TN, Cop), jnp.float32)],
        compiler_params=pltpu.CompilerParams(
            dimension_semantics=("parallel", "arbitrary")),
    )(adjp, xw, xr)
    return out[:N, :Cout]


def edge_score(ef, prep):
    # ef: [E, 2*hid] -> raw edge scores [E]
    E = ef.shape[0]
    Cp = prep["cp"]
    Ep = rup(max(E, 1), 128)
    TE = row_tile(Ep)
    efp = pad2d(ef, Ep, Cp, jnp.float32)
    out = pl.pallas_call(
        edge_score_kernel,
        out_shape=jax.ShapeDtypeStruct((Ep, 1), jnp.float32),
        grid=(Ep // TE,),
        in_specs=[pl.BlockSpec((TE, Cp), lambda i: (i, 0)),
                  pl.BlockSpec((1, Cp), lambda i: (0, 0)),
                  pl.BlockSpec(memory_space=pltpu.MemorySpace.SMEM)],
        out_specs=pl.BlockSpec((TE, 1), lambda i: (i, 0)),
        compiler_params=pltpu.CompilerParams(dimension_semantics=("parallel",)),
    )(efp, prep["w"], prep["b"])
    return out[:E, 0]


def mu_lv_sample(h, prep, seed):
    # Fused mu = h@Wmu^T+bmu, log_var = h@Wlv^T+blv, z = eps*(exp(0.5*lv)+mu) in one call.
    N, C = h.shape
    Cp = prep["cp"]
    Np = rup(max(N, 1), 128)
    TN = row_tile(Np)
    hp = pad2d(h, Np, Cp, jnp.bfloat16)
    # eps ~ U[0,1) like torch.rand_like (RNG stream itself differs from torch).
    eps = jax.random.uniform(jax.random.PRNGKey(int(seed)), (Np, Cp), jnp.float32)
    mu, lv, z = pl.pallas_call(
        mu_lv_sample_kernel,
        out_shape=(jax.ShapeDtypeStruct((Np, Cp), jnp.float32),
                   jax.ShapeDtypeStruct((Np, Cp), jnp.float32),
                   jax.ShapeDtypeStruct((Np, Cp), jnp.float32)),
        grid=(Np // TN,),
        in_specs=[pl.BlockSpec((TN, Cp), lambda i: (i, 0)),
                  pl.BlockSpec((Cp, 2 * Cp), lambda i: (0, 0)),
                  pl.BlockSpec((1, 2 * Cp), lambda i: (0, 0)),
                  pl.BlockSpec((TN, Cp), lambda i: (i, 0))],
        out_specs=(pl.BlockSpec((TN, Cp), lambda i: (i, 0)),
                   pl.BlockSpec((TN, Cp), lambda i: (i, 0)),
                   pl.BlockSpec((TN, Cp), lambda i: (i, 0))),
        compiler_params=pltpu.CompilerParams(dimension_semantics=("parallel",)),
    )(hp, prep["w"], prep["b"], eps)
    return mu[:N, :C], lv[:N, :C], z[:N, :C]


# ----------------------------------------------------------------------------- graph glue (host)
UnpoolInfo = namedtuple("UnpoolInfo",
                        ["edge_index", "cluster", "batch", "new_edge_score", "num_nodes"])


def build_adj(edge_index_np, num_nodes):
    # adj[target, source] = multiplicity (GraphConv 'add' aggregation over incoming edges)
    # TODO(synk): dense O(N^2) adjacency; a block-sparse / gather-based aggregation is the
    #             long-term fix for large graphs (roofline + VMEM limiter).
    A = np.zeros((num_nodes, num_nodes), np.float32)
    if edge_index_np.shape[1] > 0:
        np.add.at(A, (edge_index_np[1], edge_index_np[0]), 1.0)
    return A


def merge_edges_host(num_nodes, edge_index_np, batch_np, edge_score_np):
    # Mirrors EdgePooling.__merge_edges__ (greedy CPU contraction in the reference too).
    nodes_remaining = set(range(num_nodes))
    cluster = np.empty(num_nodes, dtype=np.int64)
    edge_argsort = np.argsort(edge_score_np, kind="stable")[::-1]
    i = 0
    new_edge_indices = []
    for edge_idx in edge_argsort.tolist():
        source = int(edge_index_np[0, edge_idx])
        if source not in nodes_remaining:
            continue
        target = int(edge_index_np[1, edge_idx])
        if target not in nodes_remaining:
            continue
        new_edge_indices.append(edge_idx)
        cluster[source] = i
        nodes_remaining.remove(source)
        if source != target:
            cluster[target] = i
            nodes_remaining.remove(target)
        i += 1
    for node_idx in sorted(nodes_remaining):
        cluster[node_idx] = i
        i += 1
    num_clusters = i
    ce = cluster[edge_index_np]                      # [2, E]
    pairs = np.unique(ce.T, axis=0)                  # coalesce: sort + dedup
    new_edge_index = pairs.T.astype(np.int64)
    new_batch = np.empty(num_clusters, dtype=np.int64)
    new_batch[cluster] = batch_np
    return cluster, new_edge_indices, num_clusters, new_edge_index, new_batch, len(nodes_remaining)


def edge_pooling(x, edge_index_np, batch_np, pool_prep, add_to_edge_score=0.5):
    N = x.shape[0]
    src_np, tgt_np = edge_index_np[0], edge_index_np[1]
    e_feat = jnp.concatenate([x[src_np], x[tgt_np]], axis=-1)          # [E, 2*hid]
    e = edge_score(e_feat, pool_prep)                                  # [E]  (VPU reduction)
    # dropout p=0 in EdgePooling -> identity
    # softmax over incoming edges per target node (PyG softmax)
    tgt = jnp.asarray(tgt_np.astype(np.int32))
    m = jnp.full((N,), -jnp.inf, jnp.float32).at[tgt].max(e)
    ex = jnp.exp(e - m[tgt])
    s = jnp.zeros((N,), jnp.float32).at[tgt].add(ex)
    e = ex / (s[tgt] + 1e-16)
    e = e + add_to_edge_score

    # TODO(synk): per-layer device->host sync; the greedy merge is inherently sequential
    #             (same as the PyTorch reference's .cpu() loop).
    e_np = np.asarray(jax.device_get(e))
    cluster, new_edge_idx, num_clusters, new_edge_index, new_batch, n_rem = merge_edges_host(
        N, edge_index_np, batch_np, e_np)

    cluster_j = jnp.asarray(cluster.astype(np.int32))
    new_x = jnp.zeros((num_clusters, x.shape[1]), jnp.float32).at[cluster_j].add(x)
    if len(new_edge_idx) > 0:
        sel = jnp.asarray(np.asarray(new_edge_idx, dtype=np.int32))
        kept_scores = e[sel]
    else:
        kept_scores = jnp.zeros((0,), jnp.float32)
    if n_rem > 0:
        ones = jnp.ones((num_clusters - len(new_edge_idx),), jnp.float32)
        new_edge_score = jnp.concatenate([kept_scores, ones])
    else:
        new_edge_score = kept_scores
    new_x = new_x * new_edge_score[:, None]

    info = UnpoolInfo(edge_index=edge_index_np, cluster=cluster_j, batch=batch_np,
                      new_edge_score=new_edge_score, num_nodes=N)
    return new_x, new_edge_index, new_batch, info


# ----------------------------------------------------------------------------- model
# TODO(synk): nn.Dropout layers are applied as identity (eval semantics); training-mode RNG
#             dropout masks (and torch.rand_like's exact RNG stream) are not bit-reproducible.
def encoder_forward(prep, x, edge_index_np, batch_np, depth, seed):
    unpool_infos = []
    h = jnp.asarray(x, jnp.float32)
    ei, bt = edge_index_np, batch_np
    for i in range(depth + 1):
        adj = build_adj(ei, h.shape[0])
        h = graph_conv(h, adj, prep["enc_gcn"][i], apply_norm_relu=True)
        if i != depth:
            h, ei, bt, info = edge_pooling(h, ei, bt, prep["enc_pool"][i])
            unpool_infos.append(info)
    mu, log_var, z = mu_lv_sample(h, prep["mulv"], seed)
    return h, mu, log_var, z, unpool_infos


def decoder_forward(prep, z, edge_index_np, unpool_infos, depth):
    h = z
    ei = edge_index_np
    for i in reversed(range(depth + 1)):
        p = prep["dec_gcn"][i]
        if i != 0:
            info = unpool_infos[i - 1]
            h = h / info.new_edge_score[:, None]     # unpool: undo score scaling
            h = h[info.cluster]                      # broadcast back to finer graph
            ei = info.edge_index
            adj = build_adj(ei, h.shape[0])
            h = graph_conv(h, adj, p, apply_norm_relu=True)
        else:
            adj = build_adj(ei, h.shape[0])
            h = graph_conv(h, adj, p, apply_norm_relu=False)
    return h


def hgvae_forward(prep, x, edge_index_np, batch_np, depth, seed):
    h, mu, log_var, z, infos = encoder_forward(prep, x, edge_index_np, batch_np, depth, seed)
    h_out = decoder_forward(prep, z, edge_index_np, infos, depth)
    return h_out, mu, log_var


# ----------------------------------------------------------------------------- params
def init_linear_params(key, out_c, in_c):
    k1, k2 = jax.random.split(key)
    limit = 1.0 / math.sqrt(in_c)
    w = jax.random.uniform(k1, (out_c, in_c), jnp.float32, -limit, limit)
    b = jax.random.uniform(k2, (out_c,), jnp.float32, -limit, limit)
    return w, b


def init_graphconv_params(key, in_c, out_c):
    k1, k2 = jax.random.split(key)
    limit = math.sqrt(6.0 / (in_c + out_c))  # glorot
    w_rel = jax.random.uniform(k1, (out_c, in_c), jnp.float32, -limit, limit)
    w_root = jax.random.uniform(k2, (out_c, in_c), jnp.float32, -limit, limit)
    b = jnp.zeros((out_c,), jnp.float32)
    return {"w_rel": w_rel, "w_root": w_root, "b": b}


def build_params(key, in_ch, hid, out_ch, depth):
    keys = jax.random.split(key, 4 * (depth + 1) + 8)
    ki = iter(range(len(keys)))
    params = {"enc_gcn": [], "enc_pool": [], "dec_gcn": []}
    params["enc_gcn"].append(init_graphconv_params(keys[next(ki)], in_ch, hid))
    for _ in range(depth):
        params["enc_gcn"].append(init_graphconv_params(keys[next(ki)], hid, hid))
        w, b = init_linear_params(keys[next(ki)], 1, 2 * hid)
        params["enc_pool"].append({"w": w, "b": b})
    params["mu_w"], params["mu_b"] = init_linear_params(keys[next(ki)], hid, hid)
    params["lv_w"], params["lv_b"] = init_linear_params(keys[next(ki)], hid, hid)
    params["dec_gcn"].append(init_graphconv_params(keys[next(ki)], hid, out_ch))
    for _ in range(depth):
        params["dec_gcn"].append(init_graphconv_params(keys[next(ki)], hid, hid))
    return params


# Prepare weights ONCE: transposed, padded, MXU-dtype (hoisted out of the per-layer wrappers).
def prep_graphconv(p):
    w_rel = jnp.asarray(p["w_rel"], jnp.float32)
    w_root = jnp.asarray(p["w_root"], jnp.float32)
    b = jnp.asarray(p["b"], jnp.float32)
    cout, cin = w_rel.shape
    cip, cop = rup(cin, 128), rup(cout, 128)
    wstk = jnp.zeros((cip, 2 * cop), jnp.bfloat16)
    wstk = wstk.at[:cin, :cout].set(w_rel.T.astype(jnp.bfloat16))
    wstk = wstk.at[:cin, cop:cop + cout].set(w_root.T.astype(jnp.bfloat16))
    bp = pad2d(b.reshape(1, -1), 1, cop, jnp.float32)
    return {"wstk": wstk, "b": bp, "cip": cip, "cop": cop, "cout": cout}


def prep_pool(p):
    w = jnp.asarray(p["w"], jnp.float32)          # (1, 2*hid)
    b = jnp.asarray(p["b"], jnp.float32)          # (1,)
    cp = rup(w.shape[1], 128)
    return {"w": pad2d(w, 1, cp, jnp.float32), "b": b.reshape(1), "cp": cp}


def prep_mulv(mu_w, mu_b, lv_w, lv_b):
    hid = mu_w.shape[0]
    cp = rup(hid, 128)
    w = jnp.zeros((cp, 2 * cp), jnp.bfloat16)
    w = w.at[:hid, :hid].set(jnp.asarray(mu_w, jnp.float32).T.astype(jnp.bfloat16))
    w = w.at[:hid, cp:cp + hid].set(jnp.asarray(lv_w, jnp.float32).T.astype(jnp.bfloat16))
    b = jnp.zeros((1, 2 * cp), jnp.float32)
    b = b.at[0, :hid].set(jnp.asarray(mu_b, jnp.float32))
    b = b.at[0, cp:cp + hid].set(jnp.asarray(lv_b, jnp.float32))
    return {"w": w, "b": b, "cp": cp}


def prepare_params(params):
    return {
        "enc_gcn": [prep_graphconv(p) for p in params["enc_gcn"]],
        "enc_pool": [prep_pool(p) for p in params["enc_pool"]],
        "dec_gcn": [prep_graphconv(p) for p in params["dec_gcn"]],
        "mulv": prep_mulv(params["mu_w"], params["mu_b"], params["lv_w"], params["lv_b"]),
    }


# ----------------------------------------------------------------------------- main
if __name__ == "__main__":
    in_channels, hidden_channels, out_channels, depth = 16, 32, 8, 2
    dropout_ratio = 0.5  # identity (eval)
    N, E = 24, 48

    root = jax.random.PRNGKey(0)
    k_x, k_src, k_tgt, k_params = jax.random.split(root, 4)

    x = jax.random.normal(k_x, (N, in_channels), jnp.float32)
    src = np.asarray(jax.random.randint(k_src, (E,), 0, N)).astype(np.int64)
    tgt = np.asarray(jax.random.randint(k_tgt, (E,), 0, N)).astype(np.int64)
    edge_index_np = np.stack([src, tgt], axis=0)            # [2, E]
    batch_np = np.zeros((N,), dtype=np.int64)               # batch=None -> zeros

    params = build_params(k_params, in_channels, hidden_channels, out_channels, depth)
    prep = prepare_params(params)

    h, mu, log_var = hgvae_forward(prep, x, edge_index_np, batch_np, depth, seed=1234)
    jax.block_until_ready((h, mu, log_var))

    assert h.shape == (N, out_channels)
    assert mu.shape[1] == hidden_channels and log_var.shape == mu.shape
    assert np.all(np.isfinite(np.asarray(h)))
    print("KERNEL_OK")
</pallas_src>

<mosaic_0001>
module attributes {stable_mosaic.version = 11 : i64} {
  func.func @preproj_kernel(%arg0: i32, %arg1: memref<128x128xbf16, #tpu.memory_space<vmem>>, %arg2: memref<128x256xbf16, #tpu.memory_space<vmem>>, %arg3: memref<1x128xf32, #tpu.memory_space<vmem>>, %arg4: memref<128x128xbf16, #tpu.memory_space<vmem>>, %arg5: memref<128x128xf32, #tpu.memory_space<vmem>>) attributes {dimension_semantics = [#tpu.dimension_semantics<parallel>], iteration_bounds = array<i64: 1>, scalar_prefetch = 0 : i64, scratch_operands = 0 : i64, tpu.core_type = #tpu.core_type<tc>, window_params = [{transform_indices = @transform_0, window_bounds = array<i64: 128, 128>}, {pipeline_mode = #tpu.pipeline_mode<synchronous>, transform_indices = @transform_1, window_bounds = array<i64: 128, 256>}, {pipeline_mode = #tpu.pipeline_mode<synchronous>, transform_indices = @transform_2, window_bounds = array<i64: 1, 128>}, {transform_indices = @transform_3, window_bounds = array<i64: 128, 128>}, {transform_indices = @transform_4, window_bounds = array<i64: 128, 128>}]} {
    %c0 = arith.constant 0 : index
    %c0_0 = arith.constant 0 : index
    %0 = vector.load %arg1[%c0, %c0_0] : memref<128x128xbf16, #tpu.memory_space<vmem>>, vector<128x128xbf16>
    %c0_1 = arith.constant 0 : index
    %c0_2 = arith.constant 0 : index
    %1 = vector.load %arg2[%c0_1, %c0_2] : memref<128x256xbf16, #tpu.memory_space<vmem>>, vector<128x256xbf16>
    %cst = arith.constant dense<0.000000e+00> : vector<128x256xf32>
    %2 = tpu.matmul %0, %1, %cst {dimension_numbers = #tpu.dot_dimension_numbers<[1], [0], [0], [1], [0, 0, 1, 1], [], []>} : vector<128x128xbf16>, vector<128x256xbf16>, vector<128x256xf32> -> vector<128x256xf32>
    %3 = vector.extract_strided_slice %2 {offsets = [0, 0], sizes = [128, 128], strides = [1, 1]} : vector<128x256xf32> to vector<128x128xf32>
    %4 = arith.truncf %3 : vector<128x128xf32> to vector<128x128xbf16>
    %c0_3 = arith.constant 0 : index
    %c0_4 = arith.constant 0 : index
    %5 = vector.load %arg4[%c0_3, %c0_4] : memref<128x128xbf16, #tpu.memory_space<vmem>>, vector<128x128xbf16>
    tpu.vector_store %arg4[%c0_3, %c0_4], %4 {strides = array<i32>} : memref<128x128xbf16, #tpu.memory_space<vmem>>, vector<128x128xbf16>,
    %6 = vector.extract_strided_slice %2 {offsets = [0, 128], sizes = [128, 128], strides = [1, 1]} : vector<128x256xf32> to vector<128x128xf32>
    %c0_5 = arith.constant 0 : index
    %c0_6 = arith.constant 0 : index
    %7 = vector.load %arg3[%c0_5, %c0_6] : memref<1x128xf32, #tpu.memory_space<vmem>>, vector<1x128xf32>
    %8 = vector.broadcast %7 : vector<1x128xf32> to vector<128x128xf32>
    %9 = arith.addf %6, %8 : vector<128x128xf32>
    %c0_7 = arith.constant 0 : index
    %c0_8 = arith.constant 0 : index
    %10 = vector.load %arg5[%c0_7, %c0_8] : memref<128x128xf32, #tpu.memory_space<vmem>>, vector<128x128xf32>
    tpu.vector_store %arg5[%c0_7, %c0_8], %9 {strides = array<i32>} : memref<128x128xf32, #tpu.memory_space<vmem>>, vector<128x128xf32>,
    return
  }
  func.func @transform_0(%arg0: i32) -> (i32, i32) {
    %c0_i32 = arith.constant 0 : i32
    %c0_i32_0 = arith.constant 0 : i32
    return %arg0, %c0_i32 : i32, i32
  }
  func.func @transform_1(%arg0: i32) -> (i32, i32) {
    %c0_i32 = arith.constant 0 : i32
    %c0_i32_0 = arith.constant 0 : i32
    %c0_i32_1 = arith.constant 0 : i32
    return %c0_i32, %c0_i32_0 : i32, i32
  }
  func.func @transform_2(%arg0: i32) -> (i32, i32) {
    %c0_i32 = arith.constant 0 : i32
    %c0_i32_0 = arith.constant 0 : i32
    %c0_i32_1 = arith.constant 0 : i32
    return %c0_i32, %c0_i32_0 : i32, i32
  }
  func.func @transform_3(%arg0: i32) -> (i32, i32) {
    %c0_i32 = arith.constant 0 : i32
    %c0_i32_0 = arith.constant 0 : i32
    return %arg0, %c0_i32 : i32, i32
  }
  func.func @transform_4(%arg0: i32) -> (i32, i32) {
    %c0_i32 = arith.constant 0 : i32
    %c0_i32_0 = arith.constant 0 : i32
    return %arg0, %c0_i32 : i32, i32
  }
}

</mosaic_0001>

<bundles_post_ra>
// kernel: tpu_custom_call.1
= control target key start
LH: loop header
LB: loop body
LE: loop exit
PB: predicated region body
PF: predicated region fallthrough
CT: control target
= control target key end

     0   :  { %10 = vsyncpa [#allocation3], 0  ;;  %s860_s0 = inlined_call_operand.hbm [shape: bf16[128,128], index: 0, kind: input, shape index: {}]   ;;  %s861_s1 = inlined_call_operand.hbm [shape: bf16[128,256], index: 1, kind: input, shape index: {}]   ;;  %s862_s2 = inlined_call_operand.vmem [shape: f32[1,128], index: 2, kind: input, shape index: {}]   ;;  %s863_s3 = inlined_call_operand.hbm [shape: bf16[128,128], index: 3, kind: output, shape index: {0}]   ;;  %s864_s4 = inlined_call_operand.hbm [shape: f32[128,128], index: 4, kind: output, shape index: {1}]  }
   0x1   :  { %11 = vsyncpa [#allocation6], 0 }
   0x2   :  { %12 = vsyncpa [#allocation4], 0 }
   0x3   :  { %13 = vsyncpa [#allocation9], 0  ;;  %s730_s15 = smov [#allocation2]   ;;  %s634_s19 = scalar_lea.hbm %s860_s0, 1024 }
   0x4   :  { %s19_s16 = sshll.u32 %s730_s15, 4  ;;  %p635_p0 = scmp.ne.s32.totalorder %s860_s0, %s634_s19  ;;  %s20_s16 = int_to_ptr.vmem [resolvable:$true] %s19_s16 }
   0x5   :  { %p638_p1 = scmp.lt.u32.totalorder %s634_s19, %s860_s0 }
   0x7   :  { %p640_p2 = pnand %p638_p1, %p635_p0 }
   0x9   :  { %643 = shalt.err (!%p640_p2)
}
   0xa   :  { %s644_s24 = scalar_lea.vmem %s20_s16, 1024  ;;  %p649_p4 = scmp.lt.s32.totalorder %s20_s16, %s20_s16 }
   0xb   :  { %p645_p3 = scmp.ne.s32.totalorder %s20_s16, %s644_s24  ;;  %p650_p5 = scmp.lt.s32.totalorder %s644_s24, %s644_s24 }
   0xd   :  { %p651_p6 = por %p650_p5, %p649_p4 }
   0xf   :  { %p652_p7 = pnand %p651_p6, %p645_p3 }
  0x11   :  { %655 = shalt.err (!%p652_p7)
}
  0x12   :  { %s731_s25 = smov 64   ;;  %s732_s26 = smov 4  }
  0x13   :  { %25 = dma.hbm_to_vmem [thread:$0]  %s860_s0, 1024, %s20_s16, [#allocation3], %s731_s25, %s731_s25, %s732_s26  }
  0x14   :  { %s733_s29 = smov [#allocation5]   ;;  %s656_s7 = scalar_lea.hbm %s861_s1, 2048 }
  0x15   :  { %s31_s30 = sshll.u32 %s733_s29, 4  ;;  %p657_p8 = scmp.ne.s32.totalorder %s861_s1, %s656_s7  ;;  %s32_s30 = int_to_ptr.vmem [resolvable:$true] %s31_s30 }
  0x16   :  { %p660_p9 = scmp.lt.u32.totalorder %s656_s7, %s861_s1 }
  0x18   :  { %p662_p10 = pnand %p660_p9, %p657_p8 }
  0x1a   :  { %665 = shalt.err (!%p662_p10)
}
  0x1b   :  { %s666_s12 = scalar_lea.vmem %s32_s30, 2048  ;;  %p671_p12 = scmp.lt.s32.totalorder %s32_s30, %s32_s30 }
  0x1c   :  { %p667_p11 = scmp.ne.s32.totalorder %s32_s30, %s666_s12  ;;  %p672_p13 = scmp.lt.s32.totalorder %s666_s12, %s666_s12 }
  0x1e   :  { %p673_p0 = por %p672_p13, %p671_p12 }
  0x20   :  { %p674_p1 = pnand %p673_p0, %p667_p11 }
  0x22   :  { %677 = shalt.err (!%p674_p1)
}
  0x23   :  { %s734_s0 = smov 128   ;;  %s735_s13 = smov 8  }
  0x24   :  { %37 = dma.hbm_to_vmem [thread:$0]  %s861_s1, 2048, %s32_s30, [#allocation6], %s734_s0, %s734_s0, %s735_s13  }
  0x25   :  { %722 = dma.done.wait [#allocation3], 1024  }
  0x26   :  { %723 = vsyncadd [#allocation3], 4294966272 }
  0x27   :  { %724 = dma.done.wait [#allocation6], 2048  }
  0x28   :  { %725 = vsyncadd [#allocation6], 4294965248  ;;  %v736_v0 = vmov 0   ;;  %v602_v1 = vld [vmem:[#allocation5 + $0x4] ss:$8 sps:$4 sm:$0xff]   ;;  %v630_v21 = vld [vmem:[#allocation2 + $0x10] sm:$0xff]  }
  0x29   :  { %239 = vmatprep.mubr.bf16.mxu0 %v736_v0  ;;  %279 = vmatprep.mubr.bf16.mxu1 %v736_v0  ;;  %v604_v2 = vld [vmem:[#allocation5] ss:$8 sps:$4 sm:$0xff]   ;;  %v605_v3 = vld [vmem:[#allocation5 + $0x14] ss:$8 sps:$4 sm:$0xff]   ;;  %v607_v4 = vld [vmem:[#allocation5 + $0x10] ss:$8 sps:$4 sm:$0xff]  }
  0x2a   :  { %207 = vmatprep.subr.bf16.mxu0 %v602_v1  ;;  %577 = vmatprep.subr.bf16.mxu1 %v602_v1  ;;  %v608_v5 = vld [vmem:[#allocation5 + $0x24] ss:$8 sps:$4 sm:$0xff]   ;;  %v610_v6 = vld [vmem:[#allocation5 + $0x20] ss:$8 sps:$4 sm:$0xff]   ;;  %v611_v7 = vld [vmem:[#allocation5 + $0x34] ss:$8 sps:$4 sm:$0xff]  }
  0x2b   :  { %208 = vmatpush1.bf16.msra.mxu0 %v604_v2  ;;  %585 = vmatpush1.bf16.msra.mxu1 %v604_v2  ;;  %v613_v8 = vld [vmem:[#allocation5 + $0x30] ss:$8 sps:$4 sm:$0xff]   ;;  %v614_v9 = vld [vmem:[#allocation5 + $0x44] ss:$8 sps:$4 sm:$0xff]   ;;  %v616_v10 = vld [vmem:[#allocation5 + $0x40] ss:$8 sps:$4 sm:$0xff]  }
  0x2c   :  { %209 = vmatprep.subr.bf16.mxu0 %v605_v3  ;;  %578 = vmatprep.subr.bf16.mxu1 %v605_v3  ;;  %v617_v11 = vld [vmem:[#allocation5 + $0x54] ss:$8 sps:$4 sm:$0xff]   ;;  %v619_v12 = vld [vmem:[#allocation5 + $0x50] ss:$8 sps:$4 sm:$0xff]   ;;  %v620_v13 = vld [vmem:[#allocation5 + $0x64] ss:$8 sps:$4 sm:$0xff]  }
  0x2d   :  { %v622_v14 = vld [vmem:[#allocation5 + $0x60] ss:$8 sps:$4 sm:$0xff]   ;;  %v623_v15 = vld [vmem:[#allocation5 + $0x74] ss:$8 sps:$4 sm:$0xff]   ;;  %v625_v16 = vld [vmem:[#allocation5 + $0x70] ss:$8 sps:$4 sm:$0xff]  }
  0x2e   :  { %v626_v17 = vld [vmem:[#allocation2] sm:$0xff]   ;;  %v628_v19 = vld [vmem:[#allocation2 + $0x8] sm:$0xff]   ;;  %v631_v22 = vld [vmem:[#allocation2 + $0x30] sm:$0xff]   ;;  %s738_s18 = smov [#allocation8]  }
  0x2f   :  { %210 = vmatpush1.bf16.msra.mxu0 %v607_v4  ;;  %586 = vmatpush1.bf16.msra.mxu1 %v607_v4  ;;  %v627_v18 = vld [vmem:[#allocation2 + $0x20] sm:$0xff]   ;;  %v629_v20 = vld [vmem:[#allocation2 + $0x28] sm:$0xff]   ;;  %v632_v23 = vld [vmem:[#allocation2 + $0x18] sm:$0xff]   ;;  %s456_s19 = sshll.u32 %s738_s18, 4  ;;  %s823_s19 = int_to_ptr.vmem [resolvable:$true] %s456_s19 }
  0x30   :  { %211 = vmatprep.subr.bf16.mxu0 %v608_v5  ;;  %579 = vmatprep.subr.bf16.mxu1 %v608_v5  ;;  %v633_v24 = vld [vmem:[#allocation2 + $0x38] sm:$0xff]   ;;  %v805_v25 = vld [vmem:[%s862_s2] ss:$0 sm:$0xff]  ;;  %s737_s2 = smov [#allocation7]  }
  0x31   :  { %s444_s17 = sshll.u32 %s737_s2, 4  ;;  %s445_s17 = int_to_ptr.vmem [resolvable:$true] %s444_s17 }
  0x32   :  { %s678_s20 = scalar_lea.vmem %s445_s17, 1024  ;;  %p683_p3 = scmp.lt.s32.totalorder %s445_s17, %s445_s17 }
  0x33   :  { %212 = vmatpush1.bf16.msra.mxu0 %v610_v6  ;;  %587 = vmatpush1.bf16.msra.mxu1 %v610_v6  ;;  %p679_p2 = scmp.ne.s32.totalorder %s445_s17, %s678_s20  ;;  %p684_p4 = scmp.lt.s32.totalorder %s678_s20, %s678_s20 }
  0x34   :  { %213 = vmatprep.subr.bf16.mxu0 %v611_v7  ;;  %580 = vmatprep.subr.bf16.mxu1 %v611_v7 }
  0x35   :  { %p685_p5 = por %p684_p4, %p683_p3 }
  0x37   :  { %214 = vmatpush1.bf16.msra.mxu0 %v613_v8  ;;  %588 = vmatpush1.bf16.msra.mxu1 %v613_v8  ;;  %p686_p6 = pnand %p685_p5, %p679_p2 }
  0x38   :  { %215 = vmatprep.subr.bf16.mxu0 %v614_v9  ;;  %581 = vmatprep.subr.bf16.mxu1 %v614_v9 }
  0x3b   :  { %216 = vmatpush1.bf16.msra.mxu0 %v616_v10  ;;  %589 = vmatpush1.bf16.msra.mxu1 %v616_v10 }
  0x3c   :  { %217 = vmatprep.subr.bf16.mxu0 %v617_v11  ;;  %582 = vmatprep.subr.bf16.mxu1 %v617_v11 }
  0x3f   :  { %218 = vmatpush1.bf16.msra.mxu0 %v619_v12  ;;  %590 = vmatpush1.bf16.msra.mxu1 %v619_v12 }
  0x40   :  { %219 = vmatprep.subr.bf16.mxu0 %v620_v13  ;;  %583 = vmatprep.subr.bf16.mxu1 %v620_v13 }
  0x43   :  { %220 = vmatpush1.bf16.msra.mxu0 %v622_v14  ;;  %591 = vmatpush1.bf16.msra.mxu1 %v622_v14 }
  0x44   :  { %221 = vmatprep.subr.bf16.mxu0 %v623_v15  ;;  %584 = vmatprep.subr.bf16.mxu1 %v623_v15 }
  0x47   :  { %222 = vmatpush1.bf16.msra.mxu0 %v625_v16  ;;  %592 = vmatpush1.bf16.msra.mxu1 %v625_v16 }
  0x4a   :  { %240 = vmatmul.mubr.bf16.vlgmr.msra.gmra.mrb[0].mxu0 %v626_v17  ;;  %280 = vmatmul.mubr.bf16.vlgmr.msra.gmra.mrb[0].mxu1 %v627_v18 }
  0x4b   :  { %249 = vmatprep.mubr.bf16.mxu0 %v736_v0  ;;  %289 = vmatprep.mubr.bf16.mxu1 %v736_v0 }
  0x52   :  { %250 = vmatmul.mubr.bf16.gmra.mrb[4].mxu0 %v628_v19  ;;  %290 = vmatmul.mubr.bf16.gmra.mrb[4].mxu1 %v629_v20 }
  0x53   :  { %259 = vmatprep.mubr.bf16.mxu0 %v736_v0  ;;  %299 = vmatprep.mubr.bf16.mxu1 %v736_v0 }
  0x5a   :  { %260 = vmatmul.mubr.bf16.gmra.mrb[8].mxu0 %v630_v21  ;;  %300 = vmatmul.mubr.bf16.gmra.mrb[8].mxu1 %v631_v22 }
  0x5b   :  { %269 = vmatprep.mubr.bf16.mxu0 %v736_v0  ;;  %309 = vmatprep.mubr.bf16.mxu1 %v736_v0 }
  0x62   :  { %270 = vmatmul.mubr.bf16.gmra.mrb[12].mxu0 %v632_v23  ;;  %310 = vmatmul.mubr.bf16.gmra.mrb[12].mxu1 %v633_v24 }
 0x11d   :  { %v241_v26 = vpop.f32.mrb[0].mxu0  ;;  %v281_v27 = vpop.f32.mrb[0].mxu1 }
 0x11e   :  { %v243_v28 = vpop.f32.mrb[1].mxu0  ;;  %v283_v29 = vpop.f32.mrb[1].mxu1 }
 0x11f   :  { %v407_v30 = vadd.f32 %v805_v25, %v243_v28  ;;  %v415_v31 = vadd.f32 %v805_v25, %v283_v29  ;;  %v245_v32 = vpop.f32.mrb[2].mxu0  ;;  %v285_v33 = vpop.f32.mrb[2].mxu1 }
 0x120   :  { %v533_v34 = vpack.c.bf16 %v245_v32, %v241_v26  ;;  %v553_v35 = vpack.c.bf16 %v285_v33, %v281_v27  ;;  %v247_v36 = vpop.f32.mrb[3].mxu0  ;;  %v287_v37 = vpop.f32.mrb[3].mxu1 }
 0x121   :  { %423 = vst [vmem:[#allocation8] sm:$0xff] %v407_v30  ;;  %431 = vst [vmem:[#allocation8 + $0x40] sm:$0xff] %v415_v31  ;;  %v408_v38 = vadd.f32 %v805_v25, %v247_v36  ;;  %v416_v39 = vadd.f32 %v805_v25, %v287_v37 }
 0x122   :  { %534 = vst [vmem:[#allocation7] sm:$0xff] %v533_v34   ;;  %573 = vst [vmem:[#allocation7 + $0x20] sm:$0xff] %v553_v35  }
 0x123   :  { %424 = vst [vmem:[#allocation8 + $0x8] sm:$0xff] %v408_v38  ;;  %432 = vst [vmem:[#allocation8 + $0x48] sm:$0xff] %v416_v39 }
 0x125   :  { %v251_v40 = vpop.f32.mrb[4].mxu0  ;;  %v291_v41 = vpop.f32.mrb[4].mxu1 }
 0x126   :  { %v253_v42 = vpop.f32.mrb[5].mxu0  ;;  %v293_v43 = vpop.f32.mrb[5].mxu1 }
 0x127   :  { %v409_v44 = vadd.f32 %v805_v25, %v253_v42  ;;  %v417_v45 = vadd.f32 %v805_v25, %v293_v43  ;;  %v255_v46 = vpop.f32.mrb[6].mxu0  ;;  %v295_v47 = vpop.f32.mrb[6].mxu1 }
 0x128   :  { %v538_v48 = vpack.c.bf16 %v255_v46, %v251_v40  ;;  %v558_v49 = vpack.c.bf16 %v295_v47, %v291_v41  ;;  %v257_v50 = vpop.f32.mrb[7].mxu0  ;;  %v297_v51 = vpop.f32.mrb[7].mxu1 }
 0x129   :  { %425 = vst [vmem:[#allocation8 + $0x10] sm:$0xff] %v409_v44  ;;  %433 = vst [vmem:[#allocation8 + $0x50] sm:$0xff] %v417_v45  ;;  %v410_v52 = vadd.f32 %v805_v25, %v257_v50  ;;  %v418_v53 = vadd.f32 %v805_v25, %v297_v51 }
 0x12a   :  { %570 = vst [vmem:[#allocation7 + $0x8] sm:$0xff] %v538_v48   ;;  %574 = vst [vmem:[#allocation7 + $0x28] sm:$0xff] %v558_v49  }
 0x12b   :  { %426 = vst [vmem:[#allocation8 + $0x18] sm:$0xff] %v410_v52  ;;  %434 = vst [vmem:[#allocation8 + $0x58] sm:$0xff] %v418_v53 }
 0x12d   :  { %v261_v54 = vpop.f32.mrb[8].mxu0  ;;  %v301_v55 = vpop.f32.mrb[8].mxu1 }
 0x12e   :  { %v263_v56 = vpop.f32.mrb[9].mxu0  ;;  %v303_v57 = vpop.f32.mrb[9].mxu1 }
 0x12f   :  { %v411_v58 = vadd.f32 %v805_v25, %v263_v56  ;;  %v419_v59 = vadd.f32 %v805_v25, %v303_v57  ;;  %v265_v60 = vpop.f32.mrb[10].mxu0  ;;  %v305_v61 = vpop.f32.mrb[10].mxu1 }
 0x130   :  { %v543_v62 = vpack.c.bf16 %v265_v60, %v261_v54  ;;  %v563_v63 = vpack.c.bf16 %v305_v61, %v301_v55  ;;  %v267_v0 = vpop.f32.mrb[11].mxu0  ;;  %v307_v1 = vpop.f32.mrb[11].mxu1 }
 0x131   :  { %427 = vst [vmem:[#allocation8 + $0x20] sm:$0xff] %v411_v58  ;;  %435 = vst [vmem:[#allocation8 + $0x60] sm:$0xff] %v419_v59  ;;  %v412_v2 = vadd.f32 %v805_v25, %v267_v0  ;;  %v420_v3 = vadd.f32 %v805_v25, %v307_v1 }
 0x132   :  { %571 = vst [vmem:[#allocation7 + $0x10] sm:$0xff] %v543_v62   ;;  %575 = vst [vmem:[#allocation7 + $0x30] sm:$0xff] %v563_v63  }
 0x133   :  { %428 = vst [vmem:[#allocation8 + $0x28] sm:$0xff] %v412_v2  ;;  %436 = vst [vmem:[#allocation8 + $0x68] sm:$0xff] %v420_v3 }
 0x135   :  { %v271_v4 = vpop.f32.mrb[12].mxu0  ;;  %v311_v5 = vpop.f32.mrb[12].mxu1 }
 0x136   :  { %v273_v6 = vpop.f32.mrb[13].mxu0  ;;  %v313_v7 = vpop.f32.mrb[13].mxu1 }
 0x137   :  { %v413_v8 = vadd.f32 %v805_v25, %v273_v6  ;;  %v421_v9 = vadd.f32 %v805_v25, %v313_v7  ;;  %v275_v10 = vpop.f32.mrb[14].mxu0  ;;  %v315_v11 = vpop.f32.mrb[14].mxu1 }
 0x138   :  { %v548_v12 = vpack.c.bf16 %v275_v10, %v271_v4  ;;  %v568_v13 = vpack.c.bf16 %v315_v11, %v311_v5  ;;  %v277_v14 = vpop.f32.mrb[15].mxu0  ;;  %v317_v15 = vpop.f32.mrb[15].mxu1 }
 0x139   :  { %429 = vst [vmem:[#allocation8 + $0x30] sm:$0xff] %v413_v8  ;;  %437 = vst [vmem:[#allocation8 + $0x70] sm:$0xff] %v421_v9  ;;  %v414_v16 = vadd.f32 %v805_v25, %v277_v14  ;;  %v422_v17 = vadd.f32 %v805_v25, %v317_v15 }
 0x13a   :  { %572 = vst [vmem:[#allocation7 + $0x18] sm:$0xff] %v548_v12   ;;  %576 = vst [vmem:[#allocation7 + $0x38] sm:$0xff] %v568_v13  }
 0x13b   :  { %430 = vst [vmem:[#allocation8 + $0x38] sm:$0xff] %v414_v16  ;;  %438 = vst [vmem:[#allocation8 + $0x78] sm:$0xff] %v422_v17 }
 0x13c   :  { %689 = shalt.err (!%p686_p6)
}
 0x13d   :  { %s690_s23 = scalar_lea.hbm %s863_s3, 1024 }
 0x13e   :  { %p691_p7 = scmp.ne.s32.totalorder %s863_s3, %s690_s23  ;;  %p694_p8 = scmp.lt.u32.totalorder %s690_s23, %s863_s3 }
 0x140   :  { %p696_p9 = pnand %p694_p8, %p691_p7 }
 0x142   :  { %699 = shalt.err (!%p696_p9)
}
 0x143   :  { %450 = dma.vmem_to_hbm [thread:$0]  %s445_s17, 1024, %s863_s3, [#allocation4], %s731_s25, %s731_s25, %s732_s26  }
 0x144   :  { %s700_s6 = scalar_lea.vmem %s823_s19, 2048  ;;  %p705_p11 = scmp.lt.s32.totalorder %s823_s19, %s823_s19 }
 0x145   :  { %p701_p10 = scmp.ne.s32.totalorder %s823_s19, %s700_s6  ;;  %p706_p12 = scmp.lt.s32.totalorder %s700_s6, %s700_s6 }
 0x147   :  { %p707_p13 = por %p706_p12, %p705_p11 }
 0x149   :  { %p708_p0 = pnand %p707_p13, %p701_p10 }
 0x14b   :  { %711 = shalt.err (!%p708_p0)
}
 0x14c   :  { %s712_s9 = scalar_lea.hbm %s864_s4, 2048 }
 0x14d   :  { %p713_p1 = scmp.ne.s32.totalorder %s864_s4, %s712_s9  ;;  %p716_p2 = scmp.lt.u32.totalorder %s712_s9, %s864_s4 }
 0x14f   :  { %p718_p3 = pnand %p716_p2, %p713_p1 }
 0x151   :  { %721 = shalt.err (!%p718_p3)
}
 0x152   :  { %462 = dma.vmem_to_hbm [thread:$0]  %s823_s19, 2048, %s864_s4, [#allocation9], %s734_s0, %s734_s0, %s735_s13  }
 0x153   :  { %726 = dma.done.wait [#allocation4], 1024  }
 0x154   :  { %727 = vsyncadd [#allocation4], 4294966272 }
 0x155   :  { %728 = dma.done.wait [#allocation9], 2048  }
 0x156   :  { %729 = vsyncadd [#allocation9], 4294965248 }
 0x157   :  { %469 = vsyncpa [#allocation3], 1 }
 0x158   :  { %470 = vsyncpa [#allocation6], 1 }
 0x159   :  { %471 = vsyncpa [#allocation4], 1 }
 0x15a   :  { %472 = vsyncpa [#allocation9], 1 }

</bundles_post_ra>
